<compile_context>
chip_gen: v7x
topology: tpu7x:2x2x1
jax: 0.10.0
libtpu: 0.0.40
codegen_flags: <defaults>
</compile_context>

<pallas_src>
import functools

import numpy as np
import jax
import jax.numpy as jnp
from jax import lax
from jax.experimental import pallas as pl
from jax.experimental.pallas import tpu as pltpu


# ----------------------------------------------------------------------------
# Fused kernel: im2col-conv3x3 + BN + ReLU + avg-pool (+ MLP epilogue)
# ----------------------------------------------------------------------------
def _pose_head_kernel(TB, THW, inv_hw,
                      x_ref, wconv_ref, bconv_ref,
                      w1_ref, b1_ref, w2_ref, b2_ref,
                      o_ref, acc_ref):
    # x_ref:     (TB, THW, Kp)  im2col patches for TB batch elems, THW rows
    # wconv_ref: (Kp, 128)      folded conv weight (BN2d scale absorbed)
    # bconv_ref: (1, 128)       folded conv bias / BN2d shift
    # w1_ref:    (128, 128)     folded fc1 weight (BN1d scale absorbed)
    # b1_ref:    (1, 128)       folded fc1 bias / BN1d shift
    # w2_ref:    (128, 128)     fc2 weight (out dim zero-padded 4 -> 128)
    # b2_ref:    (1, 128)       fc2 bias   (zero-padded 4 -> 128)
    # o_ref:     (1, TB, 128)   pose per batch elem (lane-dense; pose in [:4])
    # acc_ref:   (TB, 128)      pooled-sum accumulator (VMEM scratch, f32)
    h = pl.program_id(1)

    @pl.when(h == 0)
    def _init():
        acc_ref[...] = jnp.zeros_like(acc_ref)

    Kp = x_ref.shape[-1]
    patches = x_ref[...].reshape(TB * THW, Kp)            # merge leading dims

    # Single lane-dense MXU matmul: (TB*THW, Kp) @ (Kp, 128)
    y = jnp.dot(patches, wconv_ref[...], preferred_element_type=jnp.float32)
    y = jnp.maximum(y + bconv_ref[...], 0.0)               # bias + ReLU (VPU)

    # Partial spatial sum for AdaptiveAvgPool2d(1)
    acc_ref[...] += jnp.sum(y.reshape(TB, THW, 128), axis=1)   # (TB, 128)

    @pl.when(h == pl.num_programs(1) - 1)
    def _finalize():
        pooled = acc_ref[...] * inv_hw                      # mean over H*W
        hid = jnp.maximum(
            jnp.dot(pooled, w1_ref[...], preferred_element_type=jnp.float32)
            + b1_ref[...], 0.0)                             # fc1 + BN1d + ReLU
        o_ref[0] = (jnp.dot(hid, w2_ref[...], preferred_element_type=jnp.float32)
                    + b2_ref[...]).astype(o_ref.dtype)      # fc2 (pose in [:4])


def _choose_thw(HW, TB, Kp, budget_bytes=4 << 20):
    """Largest HW tile whose patch block fits a modest VMEM budget."""
    max_thw = max(8, budget_bytes // (TB * Kp * 4))
    if HW <= max_thw:
        return HW
    top = min(max_thw, HW) // 8 * 8
    for t in range(top, 7, -8):                 # divisor of HW, multiple of 8
        if HW % t == 0:
            return t
    return HW                                   # fallback: single tile


# ----------------------------------------------------------------------------
# Wrapper: layout plumbing (NCHW -> im2col, K/lane padding, batch blocking)
# ----------------------------------------------------------------------------
def pose_head_pallas(x_nchw, folded, *, max_tb=8):
    B, C, H, W = x_nchw.shape
    HW = H * W
    K = 9 * C
    Kp = 128 * pl.cdiv(K, 128)                  # lane-dense reduction dim

    # ---- im2col in the wrapper (pure layout plumbing) -----------------------
    x = jnp.transpose(x_nchw, (0, 2, 3, 1)).astype(jnp.float32)       # NHWC
    xp = jnp.pad(x, ((0, 0), (1, 1), (1, 1), (0, 0)))                 # SAME pad
    taps = [xp[:, dh:dh + H, dw:dw + W, :] for dh in range(3) for dw in range(3)]
    patches = jnp.stack(taps, axis=3).reshape(B, HW, K)               # (B,HW,9C)
    patches = jnp.pad(patches, ((0, 0), (0, 0), (0, Kp - K)))         # K -> Kp

    # ---- batch blocking: TB elems / grid step, >=2 blocks when B allows -----
    TB = max(1, min(max_tb, B // 2)) if B >= 2 else 1
    nblk = pl.cdiv(B, TB)
    Bp = nblk * TB
    if Bp != B:
        patches = jnp.pad(patches, ((0, Bp - B), (0, 0), (0, 0)))

    THW = _choose_thw(HW, TB, Kp)
    n_hw = HW // THW

    wconv = jnp.pad(folded["wconv"], ((0, Kp - K), (0, 0)))           # (Kp,128)
    w2p = jnp.pad(folded["w2"], ((0, 0), (0, 128 - folded["w2"].shape[1])))
    b2p = jnp.pad(folded["b2"], ((0, 0), (0, 128 - folded["b2"].shape[1])))

    out = pl.pallas_call(
        functools.partial(_pose_head_kernel, TB, THW, 1.0 / HW),
        out_shape=jax.ShapeDtypeStruct((nblk, TB, 128), jnp.float32),
        grid_spec=pltpu.PrefetchScalarGridSpec(
            num_scalar_prefetch=0,
            grid=(nblk, n_hw),
            in_specs=[
                pl.BlockSpec((TB, THW, Kp), lambda b, h: (b, h, 0)),   # patches
                pl.BlockSpec((Kp, 128),     lambda b, h: (0, 0)),      # conv w
                pl.BlockSpec((1, 128),      lambda b, h: (0, 0)),      # conv b
                pl.BlockSpec((128, 128),    lambda b, h: (0, 0)),      # fc1 w
                pl.BlockSpec((1, 128),      lambda b, h: (0, 0)),      # fc1 b
                pl.BlockSpec((128, 128),    lambda b, h: (0, 0)),      # fc2 w (padded)
                pl.BlockSpec((1, 128),      lambda b, h: (0, 0)),      # fc2 b (padded)
            ],
            out_specs=pl.BlockSpec((1, TB, 128), lambda b, h: (b, 0, 0)),
            scratch_shapes=[pltpu.VMEM((TB, 128), jnp.float32)],
        ),
        compiler_params=pltpu.CompilerParams(
            dimension_semantics=("parallel", "arbitrary")),
    )(patches, wconv, folded["bconv"], folded["w1"], folded["b1"], w2p, b2p)

    return out.reshape(Bp, 128)[:B, :4]                               # (B, 4)


# ----------------------------------------------------------------------------
# Deterministic parameter init (mirrors PoseHead.init_weights) + BN folding
# ----------------------------------------------------------------------------
def init_params(C, key):
    k_conv, k_fc1, k_fc2 = jax.random.split(key, 3)
    eps = 1e-3

    # Conv2d(C, 128, k=3): kaiming_normal_(fan_out, relu) -> std = sqrt(2/(128*9))
    w_conv_ochw = jax.random.normal(k_conv, (128, C, 3, 3), jnp.float32) \
        * np.sqrt(2.0 / (128 * 9))
    b_conv = jnp.zeros((128,), jnp.float32)
    g2, be2 = jnp.ones((128,), jnp.float32), jnp.zeros((128,), jnp.float32)
    rm2, rv2 = jnp.zeros((128,), jnp.float32), jnp.ones((128,), jnp.float32)

    # Linear(128,128): kaiming fan_out -> std = sqrt(2/128)
    w1_oi = jax.random.normal(k_fc1, (128, 128), jnp.float32) * np.sqrt(2.0 / 128)
    b1 = jnp.zeros((128,), jnp.float32)
    g1, be1 = jnp.ones((128,), jnp.float32), jnp.zeros((128,), jnp.float32)
    rm1, rv1 = jnp.zeros((128,), jnp.float32), jnp.ones((128,), jnp.float32)

    # Linear(128,4): kaiming fan_out -> std = sqrt(2/4)
    w2_oi = jax.random.normal(k_fc2, (4, 128), jnp.float32) * np.sqrt(2.0 / 4)
    b2 = jnp.zeros((4,), jnp.float32)

    raw = dict(w_conv_ochw=w_conv_ochw, b_conv=b_conv, g2=g2, be2=be2,
               rm2=rm2, rv2=rv2, w1_oi=w1_oi, b1=b1, g1=g1, be1=be1,
               rm1=rm1, rv1=rv1, w2_oi=w2_oi, b2=b2, eps=eps)

    # Fold eval-mode BatchNorm into the preceding affine layers.
    s2 = g2 / jnp.sqrt(rv2 + eps)
    wconv_hwio = jnp.transpose(w_conv_ochw, (2, 3, 1, 0))             # (3,3,C,128)
    wconv = (wconv_hwio * s2[None, None, None, :]).reshape(9 * C, 128)
    bconv = ((b_conv - rm2) * s2 + be2).reshape(1, 128)

    s1 = g1 / jnp.sqrt(rv1 + eps)
    w1 = w1_oi.T * s1[None, :]                                        # (in, out)
    b1f = ((b1 - rm1) * s1 + be1).reshape(1, 128)

    w2 = w2_oi.T                                                      # (128, 4)
    b2f = b2.reshape(1, 4)

    folded = dict(wconv=wconv, bconv=bconv, w1=w1, b1=b1f, w2=w2, b2=b2f)
    return raw, folded


# ----------------------------------------------------------------------------
# Pure-JAX reference (unfolded) for correctness checking
# ----------------------------------------------------------------------------
def ref_forward(x_nchw, raw):
    eps = raw["eps"]
    x = jnp.transpose(x_nchw, (0, 2, 3, 1)).astype(jnp.float32)
    w_hwio = jnp.transpose(raw["w_conv_ochw"], (2, 3, 1, 0))
    y = lax.conv_general_dilated(x, w_hwio, (1, 1), "SAME",
                                 dimension_numbers=("NHWC", "HWIO", "NHWC"))
    y = y + raw["b_conv"]
    y = (y - raw["rm2"]) / jnp.sqrt(raw["rv2"] + eps) * raw["g2"] + raw["be2"]
    y = jnp.maximum(y, 0.0)
    pooled = jnp.mean(y, axis=(1, 2))                                 # (B, 128)
    h = pooled @ raw["w1_oi"].T + raw["b1"]
    h = (h - raw["rm1"]) / jnp.sqrt(raw["rv1"] + eps) * raw["g1"] + raw["be1"]
    h = jnp.maximum(h, 0.0)
    return h @ raw["w2_oi"].T + raw["b2"]                             # (B, 4)


if __name__ == "__main__":
    B, C, H, W = 2, 4, 16, 16
    key = jax.random.PRNGKey(0)
    kx, kp = jax.random.split(key)
    spatial_features_2d = jax.random.normal(kx, (B, C, H, W), jnp.float32)

    raw, folded = init_params(C, kp)

    pose_fn = jax.jit(pose_head_pallas)
    batch_ego_pose = pose_fn(spatial_features_2d, folded)
    batch_ego_pose = jax.block_until_ready(batch_ego_pose)

    ref = ref_forward(spatial_features_2d, raw)
    assert batch_ego_pose.shape == (B, 4)
    np.testing.assert_allclose(np.asarray(batch_ego_pose), np.asarray(ref),
                               rtol=1e-4, atol=1e-4)
    print("KERNEL_OK")
</pallas_src>

<mosaic_0001>
module attributes {stable_mosaic.version = 11 : i64} {
  func.func @_pose_head_kernel(%arg0: i32, %arg1: i32, %arg2: memref<1x256x128xf32, #tpu.memory_space<vmem>>, %arg3: memref<128x128xf32, #tpu.memory_space<vmem>>, %arg4: memref<1x128xf32, #tpu.memory_space<vmem>>, %arg5: memref<128x128xf32, #tpu.memory_space<vmem>>, %arg6: memref<1x128xf32, #tpu.memory_space<vmem>>, %arg7: memref<128x128xf32, #tpu.memory_space<vmem>>, %arg8: memref<1x128xf32, #tpu.memory_space<vmem>>, %arg9: memref<1x1x128xf32, #tpu.memory_space<vmem>>, %arg10: memref<1x128xf32, #tpu.memory_space<vmem>>) attributes {dimension_semantics = [#tpu.dimension_semantics<parallel>, #tpu.dimension_semantics<arbitrary>], iteration_bounds = array<i64: 2, 1>, scalar_prefetch = 0 : i64, scratch_operands = 1 : i64, tpu.core_type = #tpu.core_type<tc>, window_params = [{transform_indices = @transform_0, window_bounds = array<i64: 1, 256, 128>}, {pipeline_mode = #tpu.pipeline_mode<synchronous>, transform_indices = @transform_1, window_bounds = array<i64: 128, 128>}, {pipeline_mode = #tpu.pipeline_mode<synchronous>, transform_indices = @transform_2, window_bounds = array<i64: 1, 128>}, {pipeline_mode = #tpu.pipeline_mode<synchronous>, transform_indices = @transform_3, window_bounds = array<i64: 128, 128>}, {pipeline_mode = #tpu.pipeline_mode<synchronous>, transform_indices = @transform_4, window_bounds = array<i64: 1, 128>}, {pipeline_mode = #tpu.pipeline_mode<synchronous>, transform_indices = @transform_5, window_bounds = array<i64: 128, 128>}, {pipeline_mode = #tpu.pipeline_mode<synchronous>, transform_indices = @transform_6, window_bounds = array<i64: 1, 128>}, {transform_indices = @transform_7, window_bounds = array<i64: 1, 1, 128>}]} {
    %c0_i32 = arith.constant 0 : i32
    %0 = arith.cmpi eq, %arg1, %c0_i32 : i32
    %1 = arith.extui %0 : i1 to i32
    %c0_i32_0 = arith.constant 0 : i32
    %2 = arith.cmpi ne, %1, %c0_i32_0 : i32
    scf.if %2 {
      %cst_15 = arith.constant 0.000000e+00 : f32
      %20 = vector.broadcast %cst_15 : f32 to vector<1x128xf32>
      %c0_16 = arith.constant 0 : index
      %c0_17 = arith.constant 0 : index
      %21 = vector.load %arg10[%c0_16, %c0_17] : memref<1x128xf32, #tpu.memory_space<vmem>>, vector<1x128xf32>
      tpu.vector_store %arg10[%c0_16, %c0_17], %20 {strides = array<i32>} : memref<1x128xf32, #tpu.memory_space<vmem>>, vector<1x128xf32>,
    } else {
    }
    %c0 = arith.constant 0 : index
    %c0_1 = arith.constant 0 : index
    %c0_2 = arith.constant 0 : index
    %3 = vector.load %arg2[%c0, %c0_1, %c0_2] : memref<1x256x128xf32, #tpu.memory_space<vmem>>, vector<1x256x128xf32>
    %4 = vector.shape_cast %3 : vector<1x256x128xf32> to vector<256x128xf32>
    %c0_3 = arith.constant 0 : index
    %c0_4 = arith.constant 0 : index
    %5 = vector.load %arg3[%c0_3, %c0_4] : memref<128x128xf32, #tpu.memory_space<vmem>>, vector<128x128xf32>
    %cst = arith.constant dense<0.000000e+00> : vector<256x128xf32>
    %6 = tpu.matmul %4, %5, %cst {dimension_numbers = #tpu.dot_dimension_numbers<[1], [0], [0], [1], [0, 0, 1, 1], [], []>} : vector<256x128xf32>, vector<128x128xf32>, vector<256x128xf32> -> vector<256x128xf32>
    %c0_5 = arith.constant 0 : index
    %c0_6 = arith.constant 0 : index
    %7 = vector.load %arg4[%c0_5, %c0_6] : memref<1x128xf32, #tpu.memory_space<vmem>>, vector<1x128xf32>
    %8 = vector.broadcast %7 : vector<1x128xf32> to vector<256x128xf32>
    %9 = arith.addf %6, %8 : vector<256x128xf32>
    %cst_7 = arith.constant 0.000000e+00 : f32
    %10 = vector.broadcast %cst_7 : f32 to vector<256x128xf32>
    %11 = arith.maximumf %9, %10 : vector<256x128xf32>
    %c0_8 = arith.constant 0 : index
    %c0_9 = arith.constant 0 : index
    %12 = vector.load %arg10[%c0_8, %c0_9] : memref<1x128xf32, #tpu.memory_space<vmem>>, vector<1x128xf32>
    %13 = vector.shape_cast %11 : vector<256x128xf32> to vector<1x256x128xf32>
    %cst_10 = arith.constant dense<0.000000e+00> : vector<1x128xf32>
    %14 = vector.multi_reduction <add>, %13, %cst_10 [1] : vector<1x256x128xf32> to vector<1x128xf32>
    %15 = arith.addf %12, %14 : vector<1x128xf32>
    %c0_11 = arith.constant 0 : index
    %c0_12 = arith.constant 0 : index
    %16 = vector.load %arg10[%c0_11, %c0_12] : memref<1x128xf32, #tpu.memory_space<vmem>>, vector<1x128xf32>
    tpu.vector_store %arg10[%c0_11, %c0_12], %15 {strides = array<i32>} : memref<1x128xf32, #tpu.memory_space<vmem>>, vector<1x128xf32>,
    %c0_i32_13 = arith.constant 0 : i32
    %17 = arith.cmpi eq, %arg1, %c0_i32_13 : i32
    %18 = arith.extui %17 : i1 to i32
    %c0_i32_14 = arith.constant 0 : i32
    %19 = arith.cmpi ne, %18, %c0_i32_14 : i32
    scf.if %19 {
      %c0_15 = arith.constant 0 : index
      %c0_16 = arith.constant 0 : index
      %20 = vector.load %arg10[%c0_15, %c0_16] : memref<1x128xf32, #tpu.memory_space<vmem>>, vector<1x128xf32>
      %cst_17 = arith.constant 3.906250e-03 : f32
      %21 = vector.broadcast %cst_17 : f32 to vector<1x128xf32>
      %22 = arith.mulf %20, %21 : vector<1x128xf32>
      %c0_18 = arith.constant 0 : index
      %c0_19 = arith.constant 0 : index
      %23 = vector.load %arg5[%c0_18, %c0_19] : memref<128x128xf32, #tpu.memory_space<vmem>>, vector<128x128xf32>
      %cst_20 = arith.constant dense<0.000000e+00> : vector<1x128xf32>
      %24 = tpu.matmul %22, %23, %cst_20 {dimension_numbers = #tpu.dot_dimension_numbers<[1], [0], [0], [1], [0, 0, 1, 1], [], []>} : vector<1x128xf32>, vector<128x128xf32>, vector<1x128xf32> -> vector<1x128xf32>
      %c0_21 = arith.constant 0 : index
      %c0_22 = arith.constant 0 : index
      %25 = vector.load %arg6[%c0_21, %c0_22] : memref<1x128xf32, #tpu.memory_space<vmem>>, vector<1x128xf32>
      %26 = arith.addf %24, %25 : vector<1x128xf32>
      %cst_23 = arith.constant 0.000000e+00 : f32
      %27 = vector.broadcast %cst_23 : f32 to vector<1x128xf32>
      %28 = arith.maximumf %26, %27 : vector<1x128xf32>
      %c0_24 = arith.constant 0 : index
      %c0_25 = arith.constant 0 : index
      %29 = vector.load %arg7[%c0_24, %c0_25] : memref<128x128xf32, #tpu.memory_space<vmem>>, vector<128x128xf32>
      %cst_26 = arith.constant dense<0.000000e+00> : vector<1x128xf32>
      %30 = tpu.matmul %28, %29, %cst_26 {dimension_numbers = #tpu.dot_dimension_numbers<[1], [0], [0], [1], [0, 0, 1, 1], [], []>} : vector<1x128xf32>, vector<128x128xf32>, vector<1x128xf32> -> vector<1x128xf32>
      %c0_27 = arith.constant 0 : index
      %c0_28 = arith.constant 0 : index
      %31 = vector.load %arg8[%c0_27, %c0_28] : memref<1x128xf32, #tpu.memory_space<vmem>>, vector<1x128xf32>
      %32 = arith.addf %30, %31 : vector<1x128xf32>
      %c0_29 = arith.constant 0 : index
      %c0_30 = arith.constant 0 : index
      %c0_31 = arith.constant 0 : index
      %33 = vector.load %arg9[%c0_29, %c0_30, %c0_31] : memref<1x1x128xf32, #tpu.memory_space<vmem>>, vector<1x1x128xf32>
      %34 = vector.shape_cast %33 : vector<1x1x128xf32> to vector<1x128xf32>
      %35 = vector.shape_cast %32 : vector<1x128xf32> to vector<1x1x128xf32>
      tpu.vector_store %arg9[%c0_29, %c0_30, %c0_31], %35 {strides = array<i32>} : memref<1x1x128xf32, #tpu.memory_space<vmem>>, vector<1x1x128xf32>,
    } else {
    }
    return
  }
  func.func @transform_0(%arg0: i32, %arg1: i32) -> (i32, i32, i32) {
    %c0_i32 = arith.constant 0 : i32
    %c0_i32_0 = arith.constant 0 : i32
    return %arg0, %arg1, %c0_i32 : i32, i32, i32
  }
  func.func @transform_1(%arg0: i32, %arg1: i32) -> (i32, i32) {
    %c0_i32 = arith.constant 0 : i32
    %c0_i32_0 = arith.constant 0 : i32
    %c0_i32_1 = arith.constant 0 : i32
    return %c0_i32, %c0_i32_0 : i32, i32
  }
  func.func @transform_2(%arg0: i32, %arg1: i32) -> (i32, i32) {
    %c0_i32 = arith.constant 0 : i32
    %c0_i32_0 = arith.constant 0 : i32
    %c0_i32_1 = arith.constant 0 : i32
    return %c0_i32, %c0_i32_0 : i32, i32
  }
  func.func @transform_3(%arg0: i32, %arg1: i32) -> (i32, i32) {
    %c0_i32 = arith.constant 0 : i32
    %c0_i32_0 = arith.constant 0 : i32
    %c0_i32_1 = arith.constant 0 : i32
    return %c0_i32, %c0_i32_0 : i32, i32
  }
  func.func @transform_4(%arg0: i32, %arg1: i32) -> (i32, i32) {
    %c0_i32 = arith.constant 0 : i32
    %c0_i32_0 = arith.constant 0 : i32
    %c0_i32_1 = arith.constant 0 : i32
    return %c0_i32, %c0_i32_0 : i32, i32
  }
  func.func @transform_5(%arg0: i32, %arg1: i32) -> (i32, i32) {
    %c0_i32 = arith.constant 0 : i32
    %c0_i32_0 = arith.constant 0 : i32
    %c0_i32_1 = arith.constant 0 : i32
    return %c0_i32, %c0_i32_0 : i32, i32
  }
  func.func @transform_6(%arg0: i32, %arg1: i32) -> (i32, i32) {
    %c0_i32 = arith.constant 0 : i32
    %c0_i32_0 = arith.constant 0 : i32
    %c0_i32_1 = arith.constant 0 : i32
    return %c0_i32, %c0_i32_0 : i32, i32
  }
  func.func @transform_7(%arg0: i32, %arg1: i32) -> (i32, i32, i32) {
    %c0_i32 = arith.constant 0 : i32
    %c0_i32_0 = arith.constant 0 : i32
    %c0_i32_1 = arith.constant 0 : i32
    return %arg0, %c0_i32, %c0_i32_0 : i32, i32, i32
  }
}

</mosaic_0001>

<bundles_post_ra>
// kernel: pose_head_pallas.1
= control target key start
LH: loop header
LB: loop body
LE: loop exit
PB: predicated region body
PF: predicated region fallthrough
CT: control target
= control target key end

     0   :  { %12 = vsyncpa [#allocation4], 0  ;;  %s1784_s0 = inlined_call_operand.vmem [shape: f32[2,256,128], index: 0, kind: input, shape index: {}]   ;;  %s1785_s1 = inlined_call_operand.vmem [shape: f32[128,128], index: 1, kind: input, shape index: {}]   ;;  %s1786_s2 = inlined_call_operand.vmem [shape: f32[1,128], index: 2, kind: input, shape index: {}]   ;;  %s1787_s3 = inlined_call_operand.vmem [shape: f32[128,128], index: 3, kind: input, shape index: {}]   ;;  %s1788_s4 = inlined_call_operand.vmem [shape: f32[1,128], index: 4, kind: input, shape index: {}]   ;;  %s1789_s5 = inlined_call_operand.vmem [shape: f32[128,128], index: 5, kind: input, shape index: {}]   ;;  %s1790_s6 = inlined_call_operand.vmem [shape: f32[1,128], index: 6, kind: input, shape index: {}]   ;;  %s1791_s7 = inlined_call_operand.hbm [shape: f32[2,1,128], index: 7, kind: output, shape index: {}]  }
   0x1   :  { %14 = vsyncpa [#allocation4 + $0x1], 0  ;;  %s1430_s24 = smov 0   ;;  %s1432_s25 = smov 0  }
   0x2   :  { %s1434_s26 = smov 0   ;;  %s1436_s27 = smov 0  }
   0x3   :  { %s1438_s28 = smov 0   ;;  %s1440_s29 = smov 0  }
   0x4 LB: > { %s924_s30 = sadd.s32 4294967295, %s1384_s29   ;;  %s925_s8 = sadd.s32 4294967294, %s1384_s29   ;;  %s1384_s29 = sphi %s1440_s29, %s20_s29   ;;  %s1380_s28 = sphi %s1438_s28, %s1798_s28   ;;  %s1376_s27 = sphi %s1436_s27, %s1797_s27   ;;  %s1372_s26 = sphi %s1434_s26, %s1796_s26   ;;  %s1368_s25 = sphi %s1432_s25, %s1795_s25   ;;  %s1364_s24 = sphi %s1430_s24, %s1794_s24  }
   0x5   : > { %s32_s9 = sadd.s32 1, %s1380_s28  ;;  %s193_s10 = sadd.s32 1, %s1372_s26 }
   0x6   : > { %p34_p0 = scmp.ge.s32.totalorder %s32_s9, 2  ;;  %p203_p1 = scmp.ne.s32.totalorder %s1372_s26, %s1368_s25 }
   0x7   : > { %p204_p2 = scmp.eq.s32.totalorder %s924_s30, 1  ;;  %p209_p3 = scmp.ne.s32.totalorder %s1368_s25, %s1364_s24 }
   0x8   : > { %s1800_s9 = smov (%p34_p0, %s32_s9), 0  ;;  %p210_p5 = scmp.eq.s32.totalorder %s925_s8, 1 }
   0x9   : > { %p1470_p4 = por %p204_p2, %p203_p1  ;;  %s190_s12 = ssub.s32 %s1380_s28, %s1800_s9 }
   0xa   : > { %p928_p6 = scmp.ge.s32.totalorder %s1384_s29, 1  ;;  %p191_p7 = scmp.eq.s32.totalorder %s190_s12, 0 }
   0xb   : > { %p1477_p8 = por %p210_p5, %p209_p3  ;;  %p259_p9 = scmp.lt.s32.totalorder %s1384_s29, 3 }
   0xc   : > { %s1483_s14 = scalar_select %p191_p7, %s1372_s26, %s193_s10  }
   0xd   : > { %p260_p10 = pnand %p928_p6, %p259_p9 }
   0xe   : > { %v341_v0 = vld [vmem:[%s1785_s1] sm:$0xff] (!%p260_p10)  ;;  %v342_v1 = vld [vmem:[%s1785_s1 + $0x8] sm:$0xff] (!%p260_p10)  ;;  %v343_v2 = vld [vmem:[%s1785_s1 + $0x10] sm:$0xff] (!%p260_p10)  ;;  %p295_p11 = scmp.lt.s32.totalorder (!%p260_p10), %s1376_s27, 1  ;;  %v1386_v59 = vmov (!%p260_p10), 0.0|0.0   ;;  %vm1388_vm0 = vmmov (!%p260_p10), 0  }
   0xf   : > { %263 = sbr.rel (%p260_p10) target bundleno = 798 (0x31e), region = 48  ;;  %v1168_v3 = vpack.c.bf16 (!%p260_p10), %v342_v1, %v341_v0  ;;  %v344_v4 = vld [vmem:[%s1785_s1 + $0x18] sm:$0xff] (!%p260_p10)  ;;  %v345_v6 = vld [vmem:[%s1785_s1 + $0x20] sm:$0xff] (!%p260_p10)  ;;  %v346_v7 = vld [vmem:[%s1785_s1 + $0x28] sm:$0xff] (!%p260_p10)  ;;  %1200 = vmatprep.subr.bf16.mxu1 (!%p260_p10), %v1386_v59  ;;  %s292_s17 = sand.u32 (!%p260_p10), 1, %s1368_s25  }
  0x10   : > { %v1172_v5 = vpack.c.bf16 (!%p260_p10), %v344_v4, %v343_v2  ;;  %v1176_v8 = vpack.c.bf16 (!%p260_p10), %v346_v7, %v345_v6  ;;  %v347_v9 = vld [vmem:[%s1785_s1 + $0x30] sm:$0xff] (!%p260_p10)  ;;  %v348_v10 = vld [vmem:[%s1785_s1 + $0x38] sm:$0xff] (!%p260_p10)  ;;  %v349_v13 = vld [vmem:[%s1785_s1 + $0x40] sm:$0xff] (!%p260_p10)  ;;  %s293_s21 = scalar_lea.vmem (!%p260_p10), [#allocation3], %s292_s17  ;;  %s843_s10 = scalar_lea.sflag (!%p260_p10), [#allocation4], %s292_s17 }
  0x11   : > { %1169 = vmatprep.subr.bf16.mxu0 (!%p260_p10), %v1168_v3  ;;  %v1180_v12 = vpack.c.bf16 (!%p260_p10), %v348_v10, %v347_v9  ;;  %v350_v14 = vld [vmem:[%s1785_s1 + $0x48] sm:$0xff] (!%p260_p10)  ;;  %v351_v16 = vld [vmem:[%s1785_s1 + $0x50] sm:$0xff] (!%p260_p10)  ;;  %v352_v17 = vld [vmem:[%s1785_s1 + $0x58] sm:$0xff] (!%p260_p10)  ;;  %s855_s22 = sshll.u32 (!%p260_p10), %s293_s21, 4  ;;  %s1739_s22 = int_to_ptr.vmem [resolvable:$true] %s855_s22 }
  0x12   : > { %1171 = vmatpush3.bf16.msra.mxu0 (!%p260_p10), %v1168_v3  ;;  %v1184_v15 = vpack.c.bf16 (!%p260_p10), %v350_v14, %v349_v13  ;;  %v1188_v18 = vpack.c.bf16 (!%p260_p10), %v352_v17, %v351_v16  ;;  %v353_v19 = vld [vmem:[%s1785_s1 + $0x60] sm:$0xff] (!%p260_p10)  ;;  %v354_v20 = vld [vmem:[%s1785_s1 + $0x68] sm:$0xff] (!%p260_p10)  ;;  %v355_v22 = vld [vmem:[%s1785_s1 + $0x70] sm:$0xff] (!%p260_p10) }
  0x13   : > { %1173 = vmatprep.subr.bf16.mxu0 (!%p260_p10), %v1172_v5  ;;  %v1192_v21 = vpack.c.bf16 (!%p260_p10), %v354_v20, %v353_v19  ;;  %v356_v23 = vld [vmem:[%s1785_s1 + $0x78] sm:$0xff] (!%p260_p10)  ;;  %v666_v56 = vld [vmem:[%s1787_s3] sm:$0xff] (!%p260_p10)  ;;  %v667_v57 = vld [vmem:[%s1787_s3 + $0x8] sm:$0xff] (!%p260_p10) }
  0x14   : > { %v1196_v24 = vpack.c.bf16 (!%p260_p10), %v356_v23, %v355_v22  ;;  %v1201_v58 = vpack.c.bf16 (!%p260_p10), %v667_v57, %v666_v56  ;;  %v668_v60 = vld [vmem:[%s1787_s3 + $0x10] sm:$0xff] (!%p260_p10)  ;;  %v669_v61 = vld [vmem:[%s1787_s3 + $0x18] sm:$0xff] (!%p260_p10)  ;;  %v670_v63 = vld [vmem:[%s1787_s3 + $0x20] sm:$0xff] (!%p260_p10) }
  0x15   : > { %v1204_v62 = vpack.c.bf16 (!%p260_p10), %v669_v61, %v668_v60  ;;  %v671_v0 = vld [vmem:[%s1787_s3 + $0x28] sm:$0xff] (!%p260_p10)  ;;  %v672_v2 = vld [vmem:[%s1787_s3 + $0x30] sm:$0xff] (!%p260_p10)  ;;  %v673_v3 = vld [vmem:[%s1787_s3 + $0x38] sm:$0xff] (!%p260_p10) }
  0x16   : > { %s296_s12 = scalar_select %p295_p11, %s1376_s27, 1  ;;  %1175 = vmatpush3.bf16.msra.mxu0 %v1172_v5  ;;  %1202 = vmatpush3.bf16.msra.mxu1 %v1201_v58  ;;  %v1207_v1 = vpack.c.bf16 %v671_v0, %v670_v63  ;;  %v1210_v4 = vpack.c.bf16 %v673_v3, %v672_v2  ;;  %v1387_v5 = vmov 0.0   ;;  %v674_v6 = vld [vmem:[%s1787_s3 + $0x40] sm:$0xff]  ;;  %v675_v7 = vld [vmem:[%s1787_s3 + $0x48] sm:$0xff]  ;;  %v676_v9 = vld [vmem:[%s1787_s3 + $0x50] sm:$0xff] }
  0x17   : > { %1177 = vmatprep.subr.bf16.mxu0 %v1176_v8  ;;  %1203 = vmatprep.subr.bf16.mxu1 %v1386_v59  ;;  %308 = vst [vmem:[#allocation2] sm:$0x1] %v1387_v5  ;;  %v677_v10 = vld [vmem:[%s1787_s3 + $0x58] sm:$0xff]  ;;  %v679_v13 = vld [vmem:[%s1787_s3 + $0x68] sm:$0xff] }
  0x18   : > { %s935_s15 = sshll.u32 %s296_s12, 8  ;;  %v681_v16 = vld [vmem:[%s1787_s3 + $0x78] sm:$0xff]  ;;  %1130 = vmatprep.mubr.msk.f32.mxu1 %vm1388_vm0, %v1387_v5  ;;  %s1306_s12 = scalar_lea.vmem %s1739_s22, 16 }
  0x19   : > { %s1508_s18 = scalar_lea.vmem %s1784_s0, %s935_s15  ;;  %p1307_p12 = scmp.ne.s32.totalorder %s1739_s22, %s1306_s12 }
  0x1a   : > { %v309_v11 = vld [vmem:[%s1508_s18] sm:$0xff]  ;;  %1179 = vmatpush3.bf16.msra.mxu0 %v1176_v8  ;;  %v310_v25 = vld [vmem:[%s1508_s18 + $0x8] sm:$0xff]  ;;  %v311_v26 = vld [vmem:[%s1508_s18 + $0x10] sm:$0xff]  ;;  %1205 = vmatpush3.bf16.msra.mxu1 %v1204_v62  ;;  %v1213_v8 = vpack.c.bf16 %v675_v7, %v674_v6 }
  0x1b   : > { %1050 = vmatprep.mubr.f32.mxu0 %v309_v11  ;;  %1181 = vmatprep.subr.bf16.mxu0 %v1180_v12  ;;  %v312_v27 = vld [vmem:[%s1508_s18 + $0x18] sm:$0xff]  ;;  %v313_v28 = vld [vmem:[%s1508_s18 + $0x20] sm:$0xff]  ;;  %v314_v29 = vld [vmem:[%s1508_s18 + $0x28] sm:$0xff]  ;;  %p1308_p13 = pnand %p1307_p12, %p1470_p4 }
  0x1c   : > { %v315_v30 = vld [vmem:[%s1508_s18 + $0x30] sm:$0xff]  ;;  %v316_v31 = vld [vmem:[%s1508_s18 + $0x38] sm:$0xff]  ;;  %v317_v32 = vld [vmem:[%s1508_s18 + $0x40] sm:$0xff]  ;;  %1206 = vmatprep.subr.bf16.mxu1 %v1386_v59 }
  0x1d   : > { %v318_v33 = vld [vmem:[%s1508_s18 + $0x48] sm:$0xff]  ;;  %v319_v34 = vld [vmem:[%s1508_s18 + $0x50] sm:$0xff]  ;;  %v320_v35 = vld [vmem:[%s1508_s18 + $0x58] sm:$0xff]  ;;  %p1309_p0 = pneg %p1308_p13 }
  0x1e   : > { %1183 = vmatpush3.bf16.msra.mxu0 %v1180_v12  ;;  %v321_v36 = vld [vmem:[%s1508_s18 + $0x60] sm:$0xff]  ;;  %v322_v37 = vld [vmem:[%s1508_s18 + $0x68] sm:$0xff]  ;;  %v323_v38 = vld [vmem:[%s1508_s18 + $0x70] sm:$0xff]  ;;  %1208 = vmatpush3.bf16.msra.mxu1 %v1207_v1  ;;  %v1216_v12 = vpack.c.bf16 %v677_v10, %v676_v9 }
  0x1f   : > { %1185 = vmatprep.subr.bf16.mxu0 %v1184_v15  ;;  %v324_v39 = vld [vmem:[%s1508_s18 + $0x78] sm:$0xff]  ;;  %v325_v40 = vld [vmem:[%s1508_s18 + $0x80] sm:$0xff]  ;;  %v326_v41 = vld [vmem:[%s1508_s18 + $0x88] sm:$0xff]  ;;  %1209 = vmatprep.subr.bf16.mxu1 %v1386_v59 }
  0x20   : > { %v327_v42 = vld [vmem:[%s1508_s18 + $0x90] sm:$0xff]  ;;  %v328_v43 = vld [vmem:[%s1508_s18 + $0x98] sm:$0xff]  ;;  %v329_v44 = vld [vmem:[%s1508_s18 + $0xa0] sm:$0xff] }
  0x21   : > { %v330_v45 = vld [vmem:[%s1508_s18 + $0xa8] sm:$0xff]  ;;  %v331_v46 = vld [vmem:[%s1508_s18 + $0xb0] sm:$0xff]  ;;  %v332_v47 = vld [vmem:[%s1508_s18 + $0xb8] sm:$0xff] }
  0x22   : > { %1187 = vmatpush3.bf16.msra.mxu0 %v1184_v15  ;;  %v333_v48 = vld [vmem:[%s1508_s18 + $0xc0] sm:$0xff]  ;;  %v334_v49 = vld [vmem:[%s1508_s18 + $0xc8] sm:$0xff]  ;;  %v335_v50 = vld [vmem:[%s1508_s18 + $0xd0] sm:$0xff]  ;;  %1211 = vmatpush3.bf16.msra.mxu1 %v1210_v4 }
  0x23   : > { %1189 = vmatprep.subr.bf16.mxu0 %v1188_v18  ;;  %v336_v51 = vld [vmem:[%s1508_s18 + $0xd8] sm:$0xff]  ;;  %v337_v52 = vld [vmem:[%s1508_s18 + $0xe0] sm:$0xff]  ;;  %v338_v53 = vld [vmem:[%s1508_s18 + $0xe8] sm:$0xff]  ;;  %1212 = vmatprep.subr.bf16.mxu1 %v1386_v59 }
  0x24   : > { %v339_v54 = vld [vmem:[%s1508_s18 + $0xf0] sm:$0xff]  ;;  %v340_v55 = vld [vmem:[%s1508_s18 + $0xf8] sm:$0xff]  ;;  %v678_v11 = vld [vmem:[%s1787_s3 + $0x60] sm:$0xff]  ;;  %s932_s18 = sshll.u32 %s1376_s27, 4  ;;  %s1389_s27 = smov [#allocation3]  }
  0x25   : > { %v1219_v14 = vpack.c.bf16 %v679_v13, %v678_v11  ;;  %v680_v15 = vld [vmem:[%s1787_s3 + $0x70] sm:$0xff]  ;;  %s1737_s8 = scalar_lea.hbm %s1791_s7, %s932_s18  ;;  %s1310_s15 = sshll.u32 %s1389_s27, 4  ;;  %s1311_s15 = int_to_ptr.vmem [resolvable:$false] %s1310_s15 }
  0x26   : > { %1191 = vmatpush3.bf16.msra.mxu0 %v1188_v18  ;;  %1214 = vmatpush3.bf16.msra.mxu1 %v1213_v8  ;;  %v1222_v17 = vpack.c.bf16 %v681_v16, %v680_v15  ;;  %v1635_v18 = vld [vmem:[%s1786_s2] ss:$0 sm:$0xff]  ;;  %s1312_s16 = scalar_lea.vmem %s1311_s15, 32  ;;  %p1313_p1 = scmp.lt.s32.totalorder %s1739_s22, %s1311_s15 }
  0x27   : > { %1193 = vmatprep.subr.bf16.mxu0 %v1192_v21  ;;  %1215 = vmatprep.subr.bf16.mxu1 %v1386_v59  ;;  %p1314_p2 = scmp.lt.s32.totalorder %s1312_s16, %s1306_s12 }
  0x29   : > { %p1315_p3 = por %p1314_p2, %p1313_p1 }
  0x2a   : > { %1195 = vmatpush3.bf16.msra.mxu0 %v1192_v21  ;;  %1217 = vmatpush3.bf16.msra.mxu1 %v1216_v12 }
  0x2b   : > { %1197 = vmatprep.subr.bf16.mxu0 %v1196_v24  ;;  %1218 = vmatprep.subr.bf16.mxu1 %v1386_v59  ;;  %p1316_p5 = pnand %p1315_p3, %p1309_p0 }
  0x2e   : > { %1199 = vmatpush3.bf16.msra.mxu0 %v1196_v24  ;;  %1220 = vmatpush3.bf16.msra.mxu1 %v1219_v14 }
  0x2f   : > { %1221 = vmatprep.subr.bf16.mxu1 %v1386_v59 }
  0x31   : > { %1051 = vmatmul.mubr.f32.vlgmr.msra.gmra.mrb[0].mxu0 %v310_v25 }
  0x32   : > { %1053 = vmatprep.mubr.f32.mxu0 %v311_v26  ;;  %1223 = vmatpush3.bf16.msra.mxu1 %v1222_v17 }
  0x33   : > { %1224 = vmatprep.subr.bf16.mxu1 %v1386_v59 }
  0x35   : > { %1054 = vmatmul.mubr.f32.gmra.mrb[2].mxu0 %v312_v27 }
  0x36   : > { %1056 = vmatprep.mubr.f32.mxu0 %v313_v28 }
  0x39   : > { %1057 = vmatmul.mubr.f32.gmra.mrb[4].mxu0 %v314_v29 }
  0x3a   : > { %1059 = vmatprep.mubr.f32.mxu0 %v315_v30 }
  0x3d   : > { %1060 = vmatmul.mubr.f32.gmra.mrb[6].mxu0 %v316_v31 }
  0x3e   : > { %1062 = vmatprep.mubr.f32.mxu0 %v317_v32 }
  0x41   : > { %1063 = vmatmul.mubr.f32.gmra.mrb[8].mxu0 %v318_v33 }
  0x42   : > { %1065 = vmatprep.mubr.f32.mxu0 %v319_v34 }
  0x45   : > { %1066 = vmatmul.mubr.f32.gmra.mrb[10].mxu0 %v320_v35 }
  0x46   : > { %1068 = vmatprep.mubr.f32.mxu0 %v321_v36 }
  0x49   : > { %1069 = vmatmul.mubr.f32.gmra.mrb[12].mxu0 %v322_v37 }
  0x4a   : > { %1071 = vmatprep.mubr.f32.mxu0 %v323_v38 }
  0x4d   : > { %1072 = vmatmul.mubr.f32.gmra.mrb[14].mxu0 %v324_v39 }
  0x4e   : > { %1074 = vmatprep.mubr.f32.mxu0 %v325_v40 }
  0x51   : > { %1075 = vmatmul.mubr.f32.gmra.mrb[16].mxu0 %v326_v41 }
  0x52   : > { %1077 = vmatprep.mubr.f32.mxu0 %v327_v42 }
  0x55   : > { %1078 = vmatmul.mubr.f32.gmra.mrb[18].mxu0 %v328_v43 }
  0x56   : > { %1080 = vmatprep.mubr.f32.mxu0 %v329_v44 }
  0x59   : > { %1081 = vmatmul.mubr.f32.gmra.mrb[20].mxu0 %v330_v45 }
  0x5a   : > { %1083 = vmatprep.mubr.f32.mxu0 %v331_v46 }
  0x5d   : > { %1084 = vmatmul.mubr.f32.gmra.mrb[22].mxu0 %v332_v47 }
  0x5e   : > { %1086 = vmatprep.mubr.f32.mxu0 %v333_v48 }
  0x61   : > { %1087 = vmatmul.mubr.f32.gmra.mrb[24].mxu0 %v334_v49 }
  0x62   : > { %1089 = vmatprep.mubr.f32.mxu0 %v335_v50 }
  0x65   : > { %1090 = vmatmul.mubr.f32.gmra.mrb[26].mxu0 %v336_v51 }
  0x66   : > { %1092 = vmatprep.mubr.f32.mxu0 %v337_v52 }
  0x69   : > { %1093 = vmatmul.mubr.f32.gmra.mrb[28].mxu0 %v338_v53 }
  0x6a   : > { %1095 = vmatprep.mubr.f32.mxu0 %v339_v54 }
  0x6d   : > { %1096 = vmatmul.mubr.f32.gmra.mrb[30].mxu0 %v340_v55 }
 0x104   : > { %v1052_v19 = vpop.f32.mrb[0].mxu0 }
 0x105   : > { %v436_v20 = vadd.f32 %v1052_v19, %v1635_v18  ;;  %v430_v21 = vpop.f32.mrb[1].mxu0 }
 0x106   : > { %v431_v22 = vadd.f32 %v1635_v18, %v430_v21 }
 0x107   : > { %v590_v23 = vmax.f32 %v436_v20, 0.0 }
 0x108   : > { %v589_v24 = vmax.f32 %v431_v22, 0.0  ;;  %v1055_v25 = vpop.f32.mrb[2].mxu0 }
 0x109   : > { %v440_v26 = vpop.f32.mrb[3].mxu0  ;;  %v446_v28 = vadd.f32 %v1055_v25, %v1635_v18 }
 0x10a   : > { %v622_v27 = vadd.f32 %v590_v23, %v589_v24  ;;  %v441_v29 = vadd.f32 %v1635_v18, %v440_v26 }
 0x10b   : > { %v592_v33 = vmax.f32 %v446_v28, 0.0 }
 0x10c   : > { %v591_v30 = vmax.f32 %v441_v29, 0.0  ;;  %v1058_v31 = vpop.f32.mrb[4].mxu0 }
 0x10d   : > { %v450_v32 = vpop.f32.mrb[5].mxu0  ;;  %v456_v35 = vadd.f32 %v1058_v31, %v1635_v18 }
 0x10e   : > { %v623_v34 = vadd.f32 %v622_v27, %v591_v30  ;;  %v451_v36 = vadd.f32 %v1635_v18, %v450_v32 }
 0x10f   : > { %v594_v41 = vmax.f32 %v456_v35, 0.0 }
 0x110   : > { %v593_v37 = vmax.f32 %v451_v36, 0.0  ;;  %v624_v38 = vadd.f32 %v623_v34, %v592_v33  ;;  %v1061_v39 = vpop.f32.mrb[6].mxu0 }
 0x111   : > { %v460_v40 = vpop.f32.mrb[7].mxu0  ;;  %v466_v43 = vadd.f32 %v1061_v39, %v1635_v18 }
 0x112   : > { %v625_v42 = vadd.f32 %v624_v38, %v593_v37  ;;  %v461_v44 = vadd.f32 %v1635_v18, %v460_v40 }
 0x113   : > { %v596_v49 = vmax.f32 %v466_v43, 0.0 }
 0x114   : > { %v595_v45 = vmax.f32 %v461_v44, 0.0  ;;  %v626_v46 = vadd.f32 %v625_v42, %v594_v41  ;;  %v1064_v47 = vpop.f32.mrb[8].mxu0 }
 0x115   : > { %v470_v48 = vpop.f32.mrb[9].mxu0  ;;  %v476_v51 = vadd.f32 %v1064_v47, %v1635_v18 }
 0x116   : > { %v627_v50 = vadd.f32 %v626_v46, %v595_v45  ;;  %v471_v52 = vadd.f32 %v1635_v18, %v470_v48 }
 0x117   : > { %v598_v57 = vmax.f32 %v476_v51, 0.0 }
 0x118   : > { %v597_v53 = vmax.f32 %v471_v52, 0.0  ;;  %v628_v54 = vadd.f32 %v627_v50, %v596_v49  ;;  %v1067_v55 = vpop.f32.mrb[10].mxu0 }
 0x119   : > { %v480_v56 = vpop.f32.mrb[11].mxu0  ;;  %v486_v60 = vadd.f32 %v1067_v55, %v1635_v18 }
 0x11a   : > { %v629_v58 = vadd.f32 %v628_v54, %v597_v53  ;;  %v481_v61 = vadd.f32 %v1635_v18, %v480_v56 }
 0x11b   : > { %v600_v2 = vmax.f32 %v486_v60, 0.0 }
 0x11c   : > { %v599_v62 = vmax.f32 %v481_v61, 0.0  ;;  %v630_v63 = vadd.f32 %v629_v58, %v598_v57  ;;  %v1070_v0 = vpop.f32.mrb[12].mxu0 }
 0x11d   : > { %v490_v1 = vpop.f32.mrb[13].mxu0  ;;  %v496_v4 = vadd.f32 %v1070_v0, %v1635_v18 }
 0x11e   : > { %v631_v3 = vadd.f32 %v630_v63, %v599_v62  ;;  %v491_v6 = vadd.f32 %v1635_v18, %v490_v1 }
 0x11f   : > { %v602_v11 = vmax.f32 %v496_v4, 0.0 }
 0x120   : > { %v601_v7 = vmax.f32 %v491_v6, 0.0  ;;  %v632_v8 = vadd.f32 %v631_v3, %v600_v2  ;;  %v1073_v9 = vpop.f32.mrb[14].mxu0 }
 0x121   : > { %v500_v10 = vpop.f32.mrb[15].mxu0  ;;  %v506_v13 = vadd.f32 %v1073_v9, %v1635_v18 }
 0x122   : > { %v633_v12 = vadd.f32 %v632_v8, %v601_v7  ;;  %v501_v14 = vadd.f32 %v1635_v18, %v500_v10 }
 0x123   : > { %v604_v20 = vmax.f32 %v506_v13, 0.0 }
 0x124   : > { %v603_v15 = vmax.f32 %v501_v14, 0.0  ;;  %v634_v16 = vadd.f32 %v633_v12, %v602_v11  ;;  %v1076_v17 = vpop.f32.mrb[16].mxu0 }
 0x125   : > { %v510_v19 = vpop.f32.mrb[17].mxu0  ;;  %v516_v22 = vadd.f32 %v1076_v17, %v1635_v18 }
 0x126   : > { %v635_v21 = vadd.f32 %v634_v16, %v603_v15  ;;  %v511_v23 = vadd.f32 %v1635_v18, %v510_v19 }
 0x127   : > { %v606_v28 = vmax.f32 %v516_v22, 0.0 }
 0x128   : > { %v605_v24 = vmax.f32 %v511_v23, 0.0  ;;  %v636_v25 = vadd.f32 %v635_v21, %v604_v20  ;;  %v1079_v26 = vpop.f32.mrb[18].mxu0 }
 0x129   : > { %v520_v27 = vpop.f32.mrb[19].mxu0  ;;  %v526_v30 = vadd.f32 %v1079_v26, %v1635_v18 }
 0x12a   : > { %v637_v29 = vadd.f32 %v636_v25, %v605_v24  ;;  %v521_v31 = vadd.f32 %v1635_v18, %v520_v27 }
 0x12b   : > { %v608_v36 = vmax.f32 %v526_v30, 0.0 }
 0x12c   : > { %v607_v32 = vmax.f32 %v521_v31, 0.0  ;;  %v638_v33 = vadd.f32 %v637_v29, %v606_v28  ;;  %v1082_v34 = vpop.f32.mrb[20].mxu0  ;;  %v621_v29 = vld [vmem:[#allocation2] sm:$0x1] }
 0x12d   : > { %v530_v35 = vpop.f32.mrb[21].mxu0  ;;  %v536_v38 = vadd.f32 %v1082_v34, %v1635_v18 }
 0x12e   : > { %v639_v37 = vadd.f32 %v638_v33, %v607_v32  ;;  %v531_v39 = vadd.f32 %v1635_v18, %v530_v35  ;;  %v754_v32 = vld [vmem:[%s1789_s5] sm:$0xff] }
 0x12f   : > { %v610_v44 = vmax.f32 %v536_v38, 0.0 }
 0x130   : > { %v609_v40 = vmax.f32 %v531_v39, 0.0  ;;  %v640_v41 = vadd.f32 %v639_v37, %v608_v36  ;;  %v1085_v42 = vpop.f32.mrb[22].mxu0  ;;  %v756_v36 = vld [vmem:[%s1789_s5 + $0x10] sm:$0xff]  ;;  %v757_v37 = vld [vmem:[%s1789_s5 + $0x18] sm:$0xff]  ;;  %v758_v39 = vld [vmem:[%s1789_s5 + $0x20] sm:$0xff] }
 0x131   : > { %v540_v43 = vpop.f32.mrb[23].mxu0  ;;  %v546_v46 = vadd.f32 %v1085_v42, %v1635_v18  ;;  %v1228_v38 = vpack.c.bf16 %v757_v37, %v756_v36  ;;  %v760_v42 = vld [vmem:[%s1789_s5 + $0x30] sm:$0xff] }
 0x132   : > { %v641_v45 = vadd.f32 %v640_v41, %v609_v40  ;;  %v541_v47 = vadd.f32 %v1635_v18, %v540_v43  ;;  %v759_v40 = vld [vmem:[%s1789_s5 + $0x28] sm:$0xff] }
 0x133   : > { %v612_v52 = vmax.f32 %v546_v46, 0.0  ;;  %v1231_v41 = vpack.c.bf16 %v759_v40, %v758_v39 }
 0x134   : > { %v611_v48 = vmax.f32 %v541_v47, 0.0  ;;  %v642_v49 = vadd.f32 %v641_v45, %v610_v44  ;;  %v1088_v50 = vpop.f32.mrb[24].mxu0  ;;  %v762_v44 = vld [vmem:[%s1789_s5 + $0x40] sm:$0xff]  ;;  %v763_v45 = vld [vmem:[%s1789_s5 + $0x48] sm:$0xff]  ;;  %v764_v47 = vld [vmem:[%s1789_s5 + $0x50] sm:$0xff] }
 0x135   : > { %v550_v51 = vpop.f32.mrb[25].mxu0  ;;  %v556_v54 = vadd.f32 %v1088_v50, %v1635_v18  ;;  %v1237_v46 = vpack.c.bf16 %v763_v45, %v762_v44  ;;  %v766_v50 = vld [vmem:[%s1789_s5 + $0x60] sm:$0xff] }
 0x136   : > { %v643_v53 = vadd.f32 %v642_v49, %v611_v48  ;;  %v551_v55 = vadd.f32 %v1635_v18, %v550_v51  ;;  %v765_v48 = vld [vmem:[%s1789_s5 + $0x58] sm:$0xff]  ;;  %v767_v51 = vld [vmem:[%s1789_s5 + $0x68] sm:$0xff] }
 0x137   : > { %v614_v61 = vmax.f32 %v556_v54, 0.0  ;;  %v1240_v49 = vpack.c.bf16 %v765_v48, %v764_v47  ;;  %v769_v54 = vld [vmem:[%s1789_s5 + $0x78] sm:$0xff] }
 0x138   : > { %v613_v56 = vmax.f32 %v551_v55, 0.0  ;;  %v644_v57 = vadd.f32 %v643_v53, %v612_v52  ;;  %v1091_v58 = vpop.f32.mrb[26].mxu0  ;;  %v1243_v52 = vpack.c.bf16 %v767_v51, %v766_v50  ;;  %v768_v53 = vld [vmem:[%s1789_s5 + $0x70] sm:$0xff] }
 0x139   : > { %v560_v60 = vpop.f32.mrb[27].mxu0  ;;  %v566_v63 = vadd.f32 %v1091_v58, %v1635_v18  ;;  %v1246_v55 = vpack.c.bf16 %v769_v54, %v768_v53 }
 0x13a   : > { %v645_v62 = vadd.f32 %v644_v57, %v613_v56  ;;  %v561_v0 = vadd.f32 %v1635_v18, %v560_v60  ;;  %v682_v56 = vld [vmem:[%s1788_s4] sm:$0x1] }
 0x13b   : > { %v616_v6 = vmax.f32 %v566_v63, 0.0 }
 0x13c   : > { %v615_v1 = vmax.f32 %v561_v0, 0.0  ;;  %v646_v2 = vadd.f32 %v645_v62, %v614_v61  ;;  %v1094_v3 = vpop.f32.mrb[28].mxu0 }
 0x13d   : > { %v570_v4 = vpop.f32.mrb[29].mxu0  ;;  %v576_v8 = vadd.f32 %v1094_v3, %v1635_v18 }
 0x13e   : > { %v647_v7 = vadd.f32 %v646_v2, %v615_v1  ;;  %v571_v9 = vadd.f32 %v1635_v18, %v570_v4 }
 0x13f   : > { %v618_v14 = vmax.f32 %v576_v8, 0.0 }
 0x140   : > { %v617_v10 = vmax.f32 %v571_v9, 0.0  ;;  %v648_v11 = vadd.f32 %v647_v7, %v616_v6  ;;  %v1097_v12 = vpop.f32.mrb[30].mxu0 }
 0x141   : > { %v580_v13 = vpop.f32.mrb[31].mxu0  ;;  %v586_v16 = vadd.f32 %v1097_v12, %v1635_v18 }
 0x142   : > { %v649_v15 = vadd.f32 %v648_v11, %v617_v10  ;;  %v581_v17 = vadd.f32 %v1635_v18, %v580_v13  ;;  %v755_v18 = vld [vmem:[%s1789_s5 + $0x8] sm:$0xff] }
 0x143   : > { %v620_v21 = vmax.f32 %v586_v16, 0.0  ;;  %v1225_v34 = vpack.c.bf16 %v755_v18, %v754_v32 }
 0x144   : > { %v619_v19 = vmax.f32 %v581_v17, 0.0  ;;  %v650_v20 = vadd.f32 %v649_v15, %v618_v14 }
 0x146   : > { %v651_v22 = vadd.f32 %v650_v20, %v619_v19 }
 0x148   : > { %v652_v23 = vadd.f32 %v651_v22, %v620_v21 }
 0x14a   : > { %v653_v24 = vrot.slane %v652_v23, 4 }
 0x14c   : > { %v654_v25 = vadd.f32 %v653_v24, %v652_v23 }
 0x14e   : > { %v655_v26 = vrot.slane %v654_v25, 2 }
 0x150   : > { %v656_v27 = vadd.f32 %v655_v26, %v654_v25 }
 0x152   : > { %v657_v28 = vrot.slane %v656_v27, 1 }
 0x154   : > { %v658_v30 = vadd.f32 %v657_v28, %v656_v27 }
 0x156   : > { %v659_v31 = vadd.f32 %v658_v30, %v621_v29 }
 0x158   : > { %660 = vst [vmem:[#allocation2] sm:$0x1] %v659_v31 }
 0x15f   : > { %v664_v33 = vld [vmem:[#allocation2] sm:$0x1] }
 0x160   : > { %v665_v35 = vmul.f32 0.00390625, %v664_v33 }
 0x162   : > { %1131 = vmatmul.mubr.f32.vlgmr.msra.gmra.mrb[0].mxu1 %v665_v35 }
 0x163   : > { %1226 = vmatpush3.bf16.msra.mxu1 %v1225_v34  ;;  %1165 = vmatprep.mubr.msk.f32.mxu1 %vm1388_vm0, %v1387_v5  ;;  %v761_v5 = vld [vmem:[%s1789_s5 + $0x38] sm:$0xff] }
 0x164   : > { %1227 = vmatprep.subr.bf16.mxu1 %v1386_v59  ;;  %v1234_v43 = vpack.c.bf16 %v761_v5, %v760_v42 }
 0x167   : > { %1229 = vmatpush3.bf16.msra.mxu1 %v1228_v38 }
 0x168   : > { %1230 = vmatprep.subr.bf16.mxu1 %v1386_v59 }
 0x16b   : > { %1232 = vmatpush3.bf16.msra.mxu1 %v1231_v41 }
 0x16c   : > { %1233 = vmatprep.subr.bf16.mxu1 %v1386_v59 }
 0x16f   : > { %1235 = vmatpush3.bf16.msra.mxu1 %v1234_v43 }
 0x170   : > { %1236 = vmatprep.subr.bf16.mxu1 %v1386_v59 }
 0x173   : > { %1238 = vmatpush3.bf16.msra.mxu1 %v1237_v46 }
 0x174   : > { %1239 = vmatprep.subr.bf16.mxu1 %v1386_v59 }
 0x177   : > { %1241 = vmatpush3.bf16.msra.mxu1 %v1240_v49 }
 0x178   : > { %1242 = vmatprep.subr.bf16.mxu1 %v1386_v59 }
 0x17b   : > { %1244 = vmatpush3.bf16.msra.mxu1 %v1243_v52 }
 0x17c   : > { %1245 = vmatprep.subr.bf16.mxu1 %v1386_v59  ;;  %v770_v59 = vld [vmem:[%s1790_s6] sm:$0x1] }
 0x17f   : > { %1247 = vmatpush3.bf16.msra.mxu1 %v1246_v55 }
 0x235   : > { %v749_v57 = vpop.f32.mrb[0].mxu1 }
 0x236   : > { %v750_v58 = vadd.f32 %v749_v57, %v682_v56  ;;  %v1132_v60 = vpop.f32.mrb[1].mxu1 }
 0x238   : > { %v753_v61 = vmax.f32 %v750_v58, 0.0 }
 0x23a   : > { %1166 = vmatmul.mubr.f32.vlgmr.msra.gmra.mrb[2].mxu1 %v753_v61 }
 0x30d   : > { %v837_v62 = vpop.f32.mrb[2].mxu1 }
 0x30e   : > { %v838_v63 = vadd.f32 %v837_v62, %v770_v59  ;;  %v1167_v0 = vpop.f32.mrb[3].mxu1 }
 0x310   : > { %841 = vst [vmem:[%s293_s21] sm:$0x1] %v838_v63 }
 0x311   : > { %1319 = shalt.err (!%p1316_p5)
}
 0x312   : > { %s1320_s17 = scalar_lea.hbm %s1737_s8, 16  ;;  %s1324_s18 = scalar_lea.hbm %s1791_s7, 32 }
 0x313   : > { %p1321_p6 = scmp.ne.s32.totalorder %s1737_s8, %s1320_s17  ;;  %p1325_p10 = scmp.lt.u32.totalorder %s1737_s8, %s1791_s7 }
 0x314   : > { %p1326_p11 = scmp.lt.u32.totalorder %s1324_s18, %s1320_s17  ;;  %p1328_p13 = scmp.lt.u32.totalorder %s1320_s17, %s1737_s8 }
 0x315   : > { %p1322_p7 = pnand %p1321_p6, %p1470_p4 }
 0x316   : > { %p1327_p12 = por %p1326_p11, %p1325_p10 }
 0x317   : > { %p1323_p9 = pneg %p1322_p7 }
 0x318   : > { %p1329_p0 = por %p1328_p13, %p1327_p12 }
 0x31a   : > { %p1330_p1 = pnand %p1329_p0, %p1323_p9 }
 0x31c   : > { %1333 = shalt.err (!%p1330_p1)
}
 0x31d   : > { %1248 = dma.vmem_to_hbm [thread:$0]  (%p1470_p4), %s1739_s22, 16, %s1737_s8, %s843_s10  }
 0x31e PF: > { %p1254_p2 = scmp.ge.s32.totalorder %s1384_s29, 2  ;;  %s867_s30 = sand.u32 1, %s1364_s24  }
 0x31f   : > { %s868_s12 = scalar_lea.sflag [#allocation4], %s867_s30 }
 0x320   : > { %p1251_p3 = pnand %p1254_p2, %p1477_p8 }
 0x322   : > { %1359 = dma.done.wait (!%p1251_p3), %s868_s12, 16  }
 0x323   : > { %1361 = vsyncadd (!%p1251_p3), %s868_s12, 4294967280  ;;  %s20_s29 = sadd.s32 1, %s1384_s29   ;;  %s1794_s24 = smov %s1368_s25 }
 0x324   : > { %p17_p5 = scmp.ge.s32.totalorder %s20_s29, 4   ;;  %s1795_s25 = smov %s1372_s26 }
 0x325   : > { %s1796_s26 = smov %s1483_s14  ;;  %s1797_s27 = smov %s1380_s28 }
 0x326   : > { %s1798_s28 = smov %s1800_s9  ;;  %19 = sbr.rel (!%p17_p5) target bundleno = 4 (0x4), region = 91 }
 0x32d   :  { %872 = vsyncpa [#allocation4], 1 }
 0x32e   :  { %874 = vsyncpa [#allocation4 + $0x1], 1 }

</bundles_post_ra>
